<compile_context>
chip_gen: v7x
topology: tpu7x:2x2x1
jax: 0.10.0
libtpu: 0.0.40
codegen_flags: <defaults>
</compile_context>

<pallas_src>
import jax
import jax.numpy as jnp
import numpy as np
from jax.experimental import pallas as pl
from jax.experimental.pallas import tpu as pltpu


_FUSED_BUDGET = 4 * 1024 * 1024   # per fused x block (4x for double-buffered in+out)
_GATE_BUDGET = 8 * 1024 * 1024    # stage-1 fallback: input-only, can go bigger
_APPLY_BUDGET = 4 * 1024 * 1024   # stage-2 fallback: in + out double-buffered
_VMEM_LIMIT = 48 * 1024 * 1024    # safe on v7x's 64 MiB physical VMEM


def _round_up(v, m):
    return ((v + m - 1) // m) * m


# ----------------------------------------------------------------------------
# Fused single-pass kernel:
#   out = x * ( sigmoid(W2 @ relu(W1 @ mean_hw(x)))  +  sigmoid(wc . x + b) )
# (algebraically equal to cSE + sSE = x*y + x*s)
# ----------------------------------------------------------------------------
def _make_fused_kernel(hw_true):
    inv_hw = 1.0 / float(hw_true)

    def fused_kernel(x_ref, w1t_ref, w2_ref, wc_ref, bc_ref, o_ref):
        x = x_ref[...]                                          # (Nb, C, HWp), native dtype
        # --- cSE gate (tiny, f32).  Padded lanes are zero -> sum unaffected;
        #     divide by the TRUE HW.
        p = jnp.sum(x.astype(jnp.float32), axis=-1, keepdims=True) * inv_hw     # (Nb,C,1)
        # fc1 + ReLU : h[n,j] = sum_c p[n,c] * W1[j,c]   (broadcast-mul + sublane reduce)
        h = jnp.maximum(
            jnp.sum(p * w1t_ref[...][None, :, :], axis=1, keepdims=True), 0.0)  # (Nb,1,Cr)
        # fc2 + sigmoid : y[n,c] = sum_j h[n,j] * W2[c,j]
        y = jax.nn.sigmoid(
            jnp.sum(h * w2_ref[...][None, :, :], axis=-1, keepdims=True))       # (Nb,C,1)
        # --- sSE gate: 1x1 conv C->1 + bias + sigmoid (channel sum in f32). ---
        wc = wc_ref[...][None, :, :].astype(x.dtype)                            # (1,C,1)
        s = jnp.sum((x * wc).astype(jnp.float32), axis=1, keepdims=True) + bc_ref[0]
        # --- out = x*y + x*sigmoid(s) = x * (y + sigmoid(s)); keep full-size ops
        #     in x's native dtype (bf16-friendly on v6e/v7x). ---
        gate = y.astype(x.dtype) + jax.nn.sigmoid(s).astype(x.dtype)            # (Nb,C,HWp)
        o_ref[...] = (x * gate).astype(o_ref.dtype)

    return fused_kernel


# ----------------------------------------------------------------------------
# Two-pass fallback, stage 1: channel gate y = sigmoid(W2 @ relu(W1 @ mean_hw(x)))
# accumulated over HW tiles.
# ----------------------------------------------------------------------------
def _make_gate_kernel(hw_true):
    inv_hw = 1.0 / float(hw_true)

    def gate_kernel(x_ref, w1t_ref, w2_ref, y_ref, acc_ref):
        hw = pl.program_id(1)

        @pl.when(hw == 0)
        def _():
            acc_ref[...] = jnp.zeros_like(acc_ref)

        # Partial per-channel sums for this HW tile (cross-lane reduce -> XLU).
        # TODO(synk): width-128 partial accumulation (reduce to 1 only in the
        # finalize) if a bundle profile ever shows the XLU/vld slots exposed.
        acc_ref[...] += jnp.sum(
            x_ref[...].astype(jnp.float32), axis=-1, keepdims=True)             # (Nb,C,1)

        @pl.when(hw == pl.num_programs(1) - 1)
        def _():
            p = acc_ref[...] * inv_hw                                            # mean
            h = jnp.maximum(
                jnp.sum(p * w1t_ref[...][None, :, :], axis=1, keepdims=True), 0.0)
            g = jax.nn.sigmoid(
                jnp.sum(h * w2_ref[...][None, :, :], axis=-1, keepdims=True))
            y_ref[...] = g.astype(y_ref.dtype)                                   # (Nb,C,1)

    return gate_kernel


# ----------------------------------------------------------------------------
# Two-pass fallback, stage 2: lane-dense elementwise  out = x * (y + sigmoid(wc.x + b))
# ----------------------------------------------------------------------------
def _apply_kernel(x_ref, y_ref, wc_ref, bc_ref, o_ref):
    x = x_ref[...]                                              # (Nb, C, tHW), native dtype
    wc = wc_ref[...][None, :, :].astype(x.dtype)                # (1, C, 1)
    s = jnp.sum((x * wc).astype(jnp.float32), axis=1, keepdims=True) + bc_ref[0]
    gate = y_ref[...].astype(x.dtype) + jax.nn.sigmoid(s).astype(x.dtype)
    o_ref[...] = (x * gate).astype(o_ref.dtype)


# ----------------------------------------------------------------------------
# Wrapper
# ----------------------------------------------------------------------------
def scse_pallas(x_nchw, w1, w2, wc, bc, *, force_two_pass=False):
    """x_nchw: (N, C, H, W).  w1: (C/r, C), w2: (C, C/r), wc: (1, C), bc: (1,)."""
    N, C, H, W = x_nchw.shape
    HW = H * W
    Cr = w1.shape[0]
    itemsize = x_nchw.dtype.itemsize

    # Flatten spatial dims and zero-pad the HW axis to a lane-dense multiple of
    # 128.  Zero padding is harmless: it adds 0 to the channel sums (we divide
    # by the true HW) and padded output lanes are sliced away below.
    HWp = _round_up(HW, 128)
    x = x_nchw.reshape(N, C, HW)
    if HWp != HW:
        x = jnp.pad(x, ((0, 0), (0, 0), (0, HWp - HW)))

    w1t = jnp.transpose(w1).astype(jnp.float32)       # (C, C/r)
    w2f = w2.astype(jnp.float32)                      # (C, C/r)
    wc_col = wc.reshape(C, 1).astype(jnp.float32)     # (C, 1)
    bc1 = bc.reshape(1).astype(jnp.float32)           # (1,)  -> SMEM

    nb_cap = max(1, N // 2)   # keep >= 2 batch grid steps -> both v7x TCs work

    def choose_nb(tile_bytes, budget):
        nb = 1
        while (2 * nb <= nb_cap and N % (2 * nb) == 0
               and 2 * nb * tile_bytes <= budget):
            nb *= 2
        return nb

    def choose_thw(budget):
        # Largest 128-multiple tile of the (already 128-aligned) HWp axis that
        # divides HWp and fits the budget for a single-sample slab.
        n_lanes = HWp // 128
        best = 1
        for k in range(1, n_lanes + 1):
            if n_lanes % k == 0 and C * 128 * k * itemsize <= budget:
                best = k
        return 128 * best

    sample_bytes = C * HWp * itemsize
    io_bytes = 2 * N * C * HWp * itemsize

    if sample_bytes <= _FUSED_BUDGET and not force_two_pass:
        # ---------------- fused single-pass path (x read from HBM once) -----
        Nb = choose_nb(sample_bytes, _FUSED_BUDGET)
        x_spec = pl.BlockSpec((Nb, C, HWp), lambda nb: (nb, 0, 0))
        out = pl.pallas_call(
            _make_fused_kernel(HW),
            out_shape=jax.ShapeDtypeStruct((N, C, HWp), x.dtype),
            grid_spec=pltpu.PrefetchScalarGridSpec(
                num_scalar_prefetch=0,
                grid=(N // Nb,),
                in_specs=[
                    x_spec,
                    pl.BlockSpec((C, Cr), lambda nb: (0, 0)),            # W1^T
                    pl.BlockSpec((C, Cr), lambda nb: (0, 0)),            # W2
                    pl.BlockSpec((C, 1), lambda nb: (0, 0)),             # conv weight
                    pl.BlockSpec(memory_space=pltpu.MemorySpace.SMEM),   # conv bias
                ],
                out_specs=x_spec,
            ),
            compiler_params=pltpu.CompilerParams(
                dimension_semantics=("parallel",),
                vmem_limit_bytes=_VMEM_LIMIT),
            cost_estimate=pl.CostEstimate(
                flops=5 * N * C * HWp,
                transcendentals=N * (HWp + C),
                bytes_accessed=io_bytes),
        )(x, w1t, w2f, wc_col, bc1)
    else:
        # ---------------- two-pass fallback (sample too big for one block) --
        # Stage 1: per-sample channel gate (input-only -> bigger tiles).
        tHW1 = choose_thw(_GATE_BUDGET)
        Nb1 = choose_nb(C * tHW1 * itemsize, _GATE_BUDGET)
        x_spec1 = pl.BlockSpec((Nb1, C, tHW1), lambda nb, hwb: (nb, 0, hwb))
        y = pl.pallas_call(
            _make_gate_kernel(HW),
            out_shape=jax.ShapeDtypeStruct((N, C, 1), jnp.float32),
            grid_spec=pltpu.PrefetchScalarGridSpec(
                num_scalar_prefetch=0,
                grid=(N // Nb1, HWp // tHW1),
                in_specs=[
                    x_spec1,
                    pl.BlockSpec((C, Cr), lambda nb, hwb: (0, 0)),       # W1^T
                    pl.BlockSpec((C, Cr), lambda nb, hwb: (0, 0)),       # W2
                ],
                out_specs=pl.BlockSpec((Nb1, C, 1), lambda nb, hwb: (nb, 0, 0)),
                scratch_shapes=[pltpu.VMEM((Nb1, C, 1), jnp.float32)],
            ),
            compiler_params=pltpu.CompilerParams(
                dimension_semantics=("parallel", "arbitrary"),
                vmem_limit_bytes=_VMEM_LIMIT),
            cost_estimate=pl.CostEstimate(
                flops=N * C * HWp,
                transcendentals=N * C,
                bytes_accessed=N * C * HWp * itemsize + N * C * 4),
        )(x, w1t, w2f)

        # Stage 2: lane-dense elementwise gating.
        tHW2 = choose_thw(_APPLY_BUDGET)
        Nb2 = choose_nb(C * tHW2 * itemsize, _APPLY_BUDGET)
        x_spec2 = pl.BlockSpec((Nb2, C, tHW2), lambda nb, hwb: (nb, 0, hwb))
        out = pl.pallas_call(
            _apply_kernel,
            out_shape=jax.ShapeDtypeStruct((N, C, HWp), x.dtype),
            grid_spec=pltpu.PrefetchScalarGridSpec(
                num_scalar_prefetch=0,
                grid=(N // Nb2, HWp // tHW2),
                in_specs=[
                    x_spec2,
                    pl.BlockSpec((Nb2, C, 1), lambda nb, hwb: (nb, 0, 0)),  # cSE gate
                    pl.BlockSpec((C, 1), lambda nb, hwb: (0, 0)),           # conv weight
                    pl.BlockSpec(memory_space=pltpu.MemorySpace.SMEM),      # conv bias
                ],
                out_specs=x_spec2,
            ),
            compiler_params=pltpu.CompilerParams(
                dimension_semantics=("parallel", "parallel"),
                vmem_limit_bytes=_VMEM_LIMIT),
            cost_estimate=pl.CostEstimate(
                flops=3 * N * C * HWp,
                transcendentals=N * HWp,
                bytes_accessed=io_bytes + N * C * 4),
        )(x, y, wc_col, bc1)

    if HWp != HW:
        out = out[:, :, :HW]
    return out.reshape(N, C, H, W)


# ----------------------------------------------------------------------------
# Pure-JAX reference mirroring the PyTorch SCSE forward
# ----------------------------------------------------------------------------
def scse_ref(x, w1, w2, wc, bc):
    N, C, H, W = x.shape
    # cSE
    p = jnp.mean(x, axis=(2, 3))                 # (N, C)
    h = jnp.maximum(p @ w1.T, 0.0)               # (N, C/r)
    y = jax.nn.sigmoid(h @ w2.T)                 # (N, C)
    cse = x * y[:, :, None, None]
    # sSE
    s = jnp.einsum("nchw,c->nhw", x, wc[0]) + bc[0]
    sse = x * jax.nn.sigmoid(s)[:, None, :, :]
    return cse + sse


if __name__ == "__main__":
    # Small shapes consistent with the module: in_ch=4, r=2, batch=2, 16x16 spatial.
    N, C, H, W = 2, 4, 16, 16
    r = 2
    Cr = C // r

    key = jax.random.PRNGKey(0)
    kx, k1, k2, k3, k4 = jax.random.split(key, 5)

    x = jax.random.normal(kx, (N, C, H, W), dtype=jnp.float32)
    # Linear weights (no bias): fc1 (C/r, C), fc2 (C, C/r)
    w1 = jax.random.normal(k1, (Cr, C), dtype=jnp.float32) * 0.5
    w2 = jax.random.normal(k2, (C, Cr), dtype=jnp.float32) * 0.5
    # 1x1 conv C -> 1: weight (1, C), bias (1,)
    wc = jax.random.normal(k3, (1, C), dtype=jnp.float32) * 0.5
    bc = jax.random.normal(k4, (1,), dtype=jnp.float32) * 0.5

    # 1) Fused single-pass path (default).
    out = jax.block_until_ready(scse_pallas(x, w1, w2, wc, bc))
    np.testing.assert_allclose(np.asarray(out), np.asarray(scse_ref(x, w1, w2, wc, bc)),
                               rtol=1e-5, atol=1e-5)

    # 2) Unaligned spatial size (15x15) -> exercises the lane-dense zero-pad path.
    x2 = jax.random.normal(kx, (N, C, 15, 15), dtype=jnp.float32)
    out2 = jax.block_until_ready(scse_pallas(x2, w1, w2, wc, bc))
    np.testing.assert_allclose(np.asarray(out2), np.asarray(scse_ref(x2, w1, w2, wc, bc)),
                               rtol=1e-5, atol=1e-5)

    # 3) Two-pass fallback (forced) — the path used when a sample exceeds VMEM budget.
    out3 = jax.block_until_ready(scse_pallas(x, w1, w2, wc, bc, force_two_pass=True))
    np.testing.assert_allclose(np.asarray(out3), np.asarray(scse_ref(x, w1, w2, wc, bc)),
                               rtol=1e-5, atol=1e-5)

    print("KERNEL_OK")
</pallas_src>

<mosaic_0001>
module attributes {stable_mosaic.version = 11 : i64} {
  func.func @fused_kernel(%arg0: i32, %arg1: memref<1x4x256xf32, #tpu.memory_space<vmem>>, %arg2: memref<4x2xf32, #tpu.memory_space<vmem>>, %arg3: memref<4x2xf32, #tpu.memory_space<vmem>>, %arg4: memref<4x1xf32, #tpu.memory_space<vmem>>, %arg5: memref<1xf32, #tpu.memory_space<smem>>, %arg6: memref<1x4x256xf32, #tpu.memory_space<vmem>>) attributes {dimension_semantics = [#tpu.dimension_semantics<parallel>], iteration_bounds = array<i64: 2>, scalar_prefetch = 0 : i64, scratch_operands = 0 : i64, tpu.core_type = #tpu.core_type<tc>, window_params = [{transform_indices = @transform_0, window_bounds = array<i64: 1, 4, 256>}, {pipeline_mode = #tpu.pipeline_mode<synchronous>, transform_indices = @transform_1, window_bounds = array<i64: 4, 2>}, {pipeline_mode = #tpu.pipeline_mode<synchronous>, transform_indices = @transform_2, window_bounds = array<i64: 4, 2>}, {pipeline_mode = #tpu.pipeline_mode<synchronous>, transform_indices = @transform_3, window_bounds = array<i64: 4, 1>}, {transform_indices = @transform_4, window_bounds = array<i64: 1>}, {transform_indices = @transform_5, window_bounds = array<i64: 1, 4, 256>}]} {
    %c0 = arith.constant 0 : index
    %c0_0 = arith.constant 0 : index
    %c0_1 = arith.constant 0 : index
    %0 = vector.load %arg1[%c0, %c0_0, %c0_1] : memref<1x4x256xf32, #tpu.memory_space<vmem>>, vector<1x4x256xf32>
    %cst = arith.constant dense<0.000000e+00> : vector<1x4xf32>
    %1 = vector.multi_reduction <add>, %0, %cst [2] : vector<1x4x256xf32> to vector<1x4xf32>
    %2 = vector.shape_cast %1 : vector<1x4xf32> to vector<1x4x1xf32>
    %cst_2 = arith.constant 3.906250e-03 : f32
    %3 = vector.broadcast %cst_2 : f32 to vector<1x4x1xf32>
    %4 = arith.mulf %2, %3 : vector<1x4x1xf32>
    %c0_3 = arith.constant 0 : index
    %c0_4 = arith.constant 0 : index
    %5 = vector.load %arg2[%c0_3, %c0_4] : memref<4x2xf32, #tpu.memory_space<vmem>>, vector<4x2xf32>
    %6 = vector.shape_cast %5 : vector<4x2xf32> to vector<1x4x2xf32>
    %7 = vector.broadcast %4 : vector<1x4x1xf32> to vector<1x4x2xf32>
    %8 = arith.mulf %7, %6 : vector<1x4x2xf32>
    %cst_5 = arith.constant dense<0.000000e+00> : vector<1x2xf32>
    %9 = vector.multi_reduction <add>, %8, %cst_5 [1] : vector<1x4x2xf32> to vector<1x2xf32>
    %10 = vector.shape_cast %9 : vector<1x2xf32> to vector<1x1x2xf32>
    %cst_6 = arith.constant 0.000000e+00 : f32
    %11 = vector.broadcast %cst_6 : f32 to vector<1x1x2xf32>
    %12 = arith.maximumf %10, %11 : vector<1x1x2xf32>
    %c0_7 = arith.constant 0 : index
    %c0_8 = arith.constant 0 : index
    %13 = vector.load %arg3[%c0_7, %c0_8] : memref<4x2xf32, #tpu.memory_space<vmem>>, vector<4x2xf32>
    %14 = vector.shape_cast %13 : vector<4x2xf32> to vector<1x4x2xf32>
    %15 = vector.broadcast %12 : vector<1x1x2xf32> to vector<1x4x2xf32>
    %16 = arith.mulf %15, %14 : vector<1x4x2xf32>
    %cst_9 = arith.constant dense<0.000000e+00> : vector<1x4xf32>
    %17 = vector.multi_reduction <add>, %16, %cst_9 [2] : vector<1x4x2xf32> to vector<1x4xf32>
    %18 = vector.shape_cast %17 : vector<1x4xf32> to vector<1x4x1xf32>
    %19 = arith.negf %18 : vector<1x4x1xf32>
    %20 = math.exp %19 : vector<1x4x1xf32>
    %cst_10 = arith.constant 1.000000e+00 : f32
    %21 = vector.broadcast %cst_10 : f32 to vector<1x4x1xf32>
    %22 = arith.addf %21, %20 : vector<1x4x1xf32>
    %23 = arith.divf %21, %22 : vector<1x4x1xf32>
    %c0_11 = arith.constant 0 : index
    %c0_12 = arith.constant 0 : index
    %24 = vector.load %arg4[%c0_11, %c0_12] : memref<4x1xf32, #tpu.memory_space<vmem>>, vector<4x1xf32>
    %25 = vector.shape_cast %24 : vector<4x1xf32> to vector<1x4x1xf32>
    %26 = vector.broadcast %25 : vector<1x4x1xf32> to vector<1x4x256xf32>
    %27 = arith.mulf %0, %26 : vector<1x4x256xf32>
    %cst_13 = arith.constant dense<0.000000e+00> : vector<1x256xf32>
    %28 = vector.multi_reduction <add>, %27, %cst_13 [1] : vector<1x4x256xf32> to vector<1x256xf32>
    %29 = vector.shape_cast %28 : vector<1x256xf32> to vector<1x1x256xf32>
    %c0_14 = arith.constant 0 : index
    %30 = memref.load %arg5[%c0_14] : memref<1xf32, #tpu.memory_space<smem>>
    %31 = vector.broadcast %30 : f32 to vector<1x1x256xf32>
    %32 = arith.addf %29, %31 : vector<1x1x256xf32>
    %33 = arith.negf %32 : vector<1x1x256xf32>
    %34 = math.exp %33 : vector<1x1x256xf32>
    %cst_15 = arith.constant 1.000000e+00 : f32
    %35 = vector.broadcast %cst_15 : f32 to vector<1x1x256xf32>
    %36 = arith.addf %35, %34 : vector<1x1x256xf32>
    %37 = arith.divf %35, %36 : vector<1x1x256xf32>
    %38 = vector.broadcast %23 : vector<1x4x1xf32> to vector<1x4x256xf32>
    %39 = vector.broadcast %37 : vector<1x1x256xf32> to vector<1x4x256xf32>
    %40 = arith.addf %38, %39 : vector<1x4x256xf32>
    %41 = arith.mulf %0, %40 : vector<1x4x256xf32>
    %c0_16 = arith.constant 0 : index
    %c0_17 = arith.constant 0 : index
    %c0_18 = arith.constant 0 : index
    %42 = vector.load %arg6[%c0_16, %c0_17, %c0_18] : memref<1x4x256xf32, #tpu.memory_space<vmem>>, vector<1x4x256xf32>
    tpu.vector_store %arg6[%c0_16, %c0_17, %c0_18], %41 {strides = array<i32>} : memref<1x4x256xf32, #tpu.memory_space<vmem>>, vector<1x4x256xf32>,
    return
  }
  func.func @transform_0(%arg0: i32) -> (i32, i32, i32) {
    %c0_i32 = arith.constant 0 : i32
    %c0_i32_0 = arith.constant 0 : i32
    %c0_i32_1 = arith.constant 0 : i32
    return %arg0, %c0_i32, %c0_i32_0 : i32, i32, i32
  }
  func.func @transform_1(%arg0: i32) -> (i32, i32) {
    %c0_i32 = arith.constant 0 : i32
    %c0_i32_0 = arith.constant 0 : i32
    %c0_i32_1 = arith.constant 0 : i32
    return %c0_i32, %c0_i32_0 : i32, i32
  }
  func.func @transform_2(%arg0: i32) -> (i32, i32) {
    %c0_i32 = arith.constant 0 : i32
    %c0_i32_0 = arith.constant 0 : i32
    %c0_i32_1 = arith.constant 0 : i32
    return %c0_i32, %c0_i32_0 : i32, i32
  }
  func.func @transform_3(%arg0: i32) -> (i32, i32) {
    %c0_i32 = arith.constant 0 : i32
    %c0_i32_0 = arith.constant 0 : i32
    %c0_i32_1 = arith.constant 0 : i32
    return %c0_i32, %c0_i32_0 : i32, i32
  }
  func.func @transform_4(%arg0: i32) -> i32 {
    %c0_i32 = arith.constant 0 : i32
    %c0_i32_0 = arith.constant 0 : i32
    return %c0_i32 : i32
  }
  func.func @transform_5(%arg0: i32) -> (i32, i32, i32) {
    %c0_i32 = arith.constant 0 : i32
    %c0_i32_0 = arith.constant 0 : i32
    %c0_i32_1 = arith.constant 0 : i32
    return %arg0, %c0_i32, %c0_i32_0 : i32, i32, i32
  }
}

</mosaic_0001>

<bundles_post_ra>
// kernel: tpu_custom_call.1
= control target key start
LH: loop header
LB: loop body
LE: loop exit
PB: predicated region body
PF: predicated region fallthrough
CT: control target
= control target key end

     0   :  { %s678_s0 = inlined_call_operand.vmem [shape: f32[2,4,256], index: 0, kind: input, shape index: {}]   ;;  %s679_s1 = inlined_call_operand.vmem [shape: f32[4,2], index: 1, kind: input, shape index: {}]   ;;  %s680_s2 = inlined_call_operand.vmem [shape: f32[4,2], index: 2, kind: input, shape index: {}]   ;;  %s681_s3 = inlined_call_operand.vmem [shape: f32[4,1], index: 3, kind: input, shape index: {}]   ;;  %s682_s4 = inlined_call_operand.<no memory space> [shape: f32[1], index: 4, kind: input, shape index: {}]   ;;  %s683_s5 = inlined_call_operand.hbm [shape: f32[2,4,256], index: 5, kind: output, shape index: {}]  }
   0x1   :  { %10 = sst [smem:[#allocation2]] %s682_s4 }
   0x2   :  { %11 = vsyncpa [#allocation4], 0 }
   0x3   :  { %13 = vsyncpa [#allocation4 + $0x1], 0  ;;  %s558_s20 = smov 0   ;;  %s560_s21 = smov 0  }
   0x4   :  { %s562_s22 = smov 0   ;;  %s564_s23 = smov 0  }
   0x5 LB: > { %s579_s4 = sadd.s32 4294967295, %s520_s23   ;;  %s386_s24 = sadd.s32 4294967294, %s520_s23   ;;  %s520_s23 = sphi %s564_s23, %s689_s23   ;;  %s516_s22 = sphi %s562_s22, %s688_s22   ;;  %s512_s21 = sphi %s560_s21, %s687_s21   ;;  %s508_s20 = sphi %s558_s20, %s686_s20  }
   0x6   : > { %s583_s25 = sadd.s32 1, %s520_s23   ;;  %s136_s26 = sadd.s32 1, %s516_s22 }
   0x7   : > { %s133_s27 = ssub.s32 %s520_s23, %s583_s25  ;;  %p146_p0 = scmp.ne.s32.totalorder %s516_s22, %s512_s21 }
   0x8   : > { %p134_p1 = scmp.eq.s32.totalorder %s133_s27, 0  ;;  %p147_p2 = scmp.eq.s32.totalorder %s579_s4, 1 }
   0x9   : > { %p152_p3 = scmp.ne.s32.totalorder %s512_s21, %s508_s20  ;;  %p153_p4 = scmp.eq.s32.totalorder %s386_s24, 1 }
   0xa   : > { %s594_s28 = scalar_select %p134_p1, %s516_s22, %s136_s26  }
   0xb   : > { %p596_p5 = por %p147_p2, %p146_p0  ;;  %p600_p6 = por %p153_p4, %p152_p3 }
   0xc   : > { %p389_p7 = scmp.ge.s32.totalorder %s520_s23, 1  ;;  %p191_p8 = scmp.lt.s32.totalorder %s520_s23, 3 }
   0xe   : > { %p192_p9 = pnand %p389_p7, %p191_p8 }
   0xf   : > { %p219_p10 = scmp.lt.s32.totalorder (!%p192_p9), %s579_s4, 1  ;;  %vm228_vm0 = vcmask (!%p192_p9), 1043456   ;;  %v522_v5 = vmov (!%p192_p9), 0   ;;  %v257_v6 = vld [vmem:[%s681_s3] sm:$0xf] (!%p192_p9)  ;;  %vm237_vm1 = vcmask (!%p192_p9), 11264   ;;  %v265_v24 = vlaneseq (!%p192_p9) }
  0x10   : > { %195 = sbr.rel (%p192_p9) target bundleno = 385 (0x181), region = 40  ;;  %444 = vset.pattern.permute.xlu0 (!%p192_p9), %v522_v5  ;;  %v235_v7 = vld [vmem:[%s679_s1] sm:$0xf] (!%p192_p9)  ;;  %v523_v22 = vmov (!%p192_p9), 839922192   ;;  %s288_s17 = sld [smem:[#allocation2]] (!%p192_p9) }
  0x11   : > { %v246_v18 = vld [vmem:[%s680_s2] sm:$0xf] (!%p192_p9)  ;;  %v263_v23 = vunpack.c.l.s4 (!%p192_p9), %v523_v22  ;;  %v266_v26 = vshrl.u32 (!%p192_p9), %v265_v24, 7  ;;  %s216_s18 = sand.u32 (!%p192_p9), 1, %s512_s21   ;;  %s402_s24 = sshll.u32 (!%p192_p9), %s579_s4, 7 }
  0x12   : > { %s390_s19 = sshll.u32 (!%p192_p9), %s216_s18, 3  ;;  %s636_s8 = scalar_lea.hbm (!%p192_p9), %s683_s5, %s402_s24 }
  0x13   : > { %v264_v25 = vunpack.c.0.s8 (!%p192_p9), %v263_v23  ;;  %s218_s26 = scalar_lea.vmem (!%p192_p9), [#allocation3], %s390_s19  ;;  %s313_s9 = scalar_lea.sflag (!%p192_p9), [#allocation4], %s216_s18 }
  0x14   : > { %s327_s27 = sshll.u32 (!%p192_p9), %s218_s26, 4  ;;  %s638_s27 = int_to_ptr.vmem [resolvable:$true] %s327_s27 }
  0x15   : > { %v267_v27 = vsub.s32 (!%p192_p9), %v264_v25, %v266_v26 }
  0x16   : > { %v289_v45 = vstv (!%p192_p9), %s288_s17 }
  0x17   : > { %s220_s6 = scalar_select %p219_p10, %s579_s4, 1 }
  0x18   : > { %s524_s4 = smov [#allocation3]  }
  0x19   : > { %s401_s7 = sshll.u32 %s220_s6, 3  ;;  %s462_s11 = sshll.u32 %s524_s4, 4  ;;  %s463_s11 = int_to_ptr.vmem [resolvable:$false] %s462_s11 }
  0x1a   : > { %s223_s10 = scalar_lea.vmem %s678_s0, %s401_s7  ;;  %s464_s12 = scalar_lea.vmem %s463_s11, 256 }
  0x1b   : > { %v611_v0 = vld [vmem:[%s223_s10] sm:$0xff]  ;;  %s458_s10 = scalar_lea.vmem %s638_s27, 128  ;;  %p465_p0 = scmp.lt.s32.totalorder %s638_s27, %s463_s11 }
  0x1c   : > { %v226_v1 = vcombine.high %v611_v0, %v611_v0  ;;  %v229_v2 = vsel %vm228_vm0, %v611_v0, 0.0  ;;  %p459_p11 = scmp.ne.s32.totalorder %s638_s27, %s458_s10  ;;  %p466_p1 = scmp.lt.s32.totalorder %s464_s12, %s458_s10 }
  0x1e   : > { %v230_v3 = vsel %vm228_vm0, %v226_v1, 0.0  ;;  %p460_p12 = pnand %p459_p11, %p596_p5  ;;  %p467_p2 = por %p466_p1, %p465_p0 }
  0x1f   : > { %v231_v4 = vadd.f32 %v230_v3, %v229_v2 }
  0x20   : > { %p461_p13 = pneg %p460_p12 }
  0x21   : > { %232 = vadd.xlane.f32.xlu0 %v231_v4 }
  0x22   : > { %p468_p3 = pnand %p467_p2, %p461_p13 }
  0x37   : > { %260 = vperm.xlu0 %444, %v257_v6  }
  0xae   : > { %v233_v8 = vpop.xlane.xlu0 %232 }
  0xaf   : > { %v234_v9 = vmul.f32 0.00390625, %v233_v8 }
  0xb1   : > { %v236_v10 = vmul.f32 %v235_v7, %v234_v9 }
  0xb3   : > { %v238_v11 = vsel %vm237_vm1, %v236_v10, 0.0 }
  0xb4   : > { %v239_v12 = vrot.slane %v238_v11, 4 }
  0xb6   : > { %v240_v13 = vadd.f32 %v239_v12, %v238_v11  ;;  %v261_v28 = vpop.permute.xlu0 %260 }
  0xb7   : > { %v268_v29 = vrot.slane %v261_v28, %v267_v27 }
  0xb8   : > { %v241_v14 = vrot.slane %v240_v13, 2 }
  0xb9   : > { %v270_v30 = vmul.f32 %v268_v29, %v611_v0 }
  0xba   : > { %v242_v15 = vadd.f32 %v241_v14, %v240_v13 }
  0xbb   : > { %v272_v31 = vcombine.high %v270_v30, %v270_v30  ;;  %v274_v32 = vsel %vm228_vm0, %v270_v30, 0.0 }
  0xbc   : > { %v243_v16 = vrot.slane %v242_v15, 1  ;;  %v275_v34 = vrot.slane %v274_v32, 4 }
  0xbd   : > { %v281_v33 = vsel %vm228_vm0, %v272_v31, 0.0 }
  0xbe   : > { %v244_v17 = vadd.f32 %v243_v16, %v242_v15  ;;  %v282_v35 = vrot.slane %v281_v33, 4  ;;  %v276_v36 = vadd.f32 %v275_v34, %v274_v32 }
  0xc0   : > { %v245_v19 = vmax.f32 %v244_v17, 0.0  ;;  %v283_v37 = vadd.f32 %v282_v35, %v281_v33  ;;  %v277_v38 = vrot.slane %v276_v36, 2 }
  0xc2   : > { %v247_v20 = vmul.f32 %v246_v18, %v245_v19  ;;  %v284_v39 = vrot.slane %v283_v37, 2  ;;  %v278_v40 = vadd.f32 %v277_v38, %v276_v36 }
  0xc4   : > { %v248_v21 = vsel %vm237_vm1, %v247_v20, 0.0  ;;  %v285_v41 = vadd.f32 %v284_v39, %v283_v37  ;;  %v279_v42 = vrot.slane %v278_v40, 1 }
  0xc5   : > { %249 = vadd.xlane.f32.xlu1 %v248_v21 }
  0xc6   : > { %v286_v43 = vrot.slane %v285_v41, 1  ;;  %v280_v44 = vadd.f32 %v279_v42, %v278_v40 }
  0xc8   : > { %v287_v46 = vadd.f32 %v286_v43, %v285_v41  ;;  %v290_v47 = vadd.f32 %v289_v45, %v280_v44 }
  0xca   : > { %v291_v48 = vadd.f32 %v289_v45, %v287_v46  ;;  %v394_v49 = vmul.f32 -1.442695, %v290_v47 }
  0xcc   : > { %v395_v50 = vmul.f32 -1.442695, %v291_v48  ;;  %446 = vpow2.f32 %v394_v49 }
  0xce   : > { %448 = vpow2.f32 %v395_v50 }
  0xd6   : > { %v447_v53 = vpop.eup %446 }
  0xd7   : > { %v298_v55 = vadd.f32 1.0, %v447_v53 }
  0xd8   : > { %v449_v54 = vpop.eup %448 }
  0xd9   : > { %v299_v56 = vadd.f32 1.0, %v449_v54 }
 0x152   : > { %v250_v51 = vpop.xlane.xlu1 %249 }
 0x153   : > { %v393_v52 = vmul.f32 -1.442695, %v250_v51 }
 0x155   : > { %450 = vpow2.f32 %v393_v52 }
 0x156   : > { %452 = vrcp.f32 %v298_v55 }
 0x157   : > { %454 = vrcp.f32 %v299_v56 }
 0x15f   : > { %v451_v57 = vpop.eup %450 }
 0x160   : > { %v254_v58 = vadd.f32 1.0, %v451_v57  ;;  %v453_v59 = vpop.eup %452 }
 0x161   : > { %v455_v60 = vpop.eup %454 }
 0x162   : > { %456 = vrcp.f32 %v254_v58 }
 0x16c   : > { %v457_v61 = vpop.eup %456 }
 0x16d   : > { %v304_v62 = vadd.f32 %v457_v61, %v453_v59  ;;  %v305_v63 = vadd.f32 %v457_v61, %v455_v60 }
 0x16f   : > { %v308_v1 = vcombine.low %v304_v62, %v305_v63 }
 0x171   : > { %v310_v2 = vmul.f32 %v308_v1, %v611_v0 }
 0x173   : > { %311 = vst [vmem:[%s218_s26] sm:$0xff] %v310_v2 }
 0x174   : > { %471 = shalt.err (!%p468_p3)
}
 0x175   : > { %s472_s13 = scalar_lea.hbm %s636_s8, 128  ;;  %s476_s16 = scalar_lea.hbm %s683_s5, 256 }
 0x176   : > { %p473_p4 = scmp.ne.s32.totalorder %s636_s8, %s472_s13  ;;  %p477_p9 = scmp.lt.u32.totalorder %s636_s8, %s683_s5 }
 0x177   : > { %p478_p10 = scmp.lt.u32.totalorder %s476_s16, %s472_s13  ;;  %p480_p12 = scmp.lt.u32.totalorder %s472_s13, %s636_s8 }
 0x178   : > { %p474_p7 = pnand %p473_p4, %p596_p5 }
 0x179   : > { %p479_p11 = por %p478_p10, %p477_p9 }
 0x17a   : > { %p475_p8 = pneg %p474_p7 }
 0x17b   : > { %p481_p13 = por %p480_p12, %p479_p11 }
 0x17d   : > { %p482_p0 = pnand %p481_p13, %p475_p8 }
 0x17f   : > { %485 = shalt.err (!%p482_p0)
}
 0x180   : > { %403 = dma.vmem_to_hbm [thread:$0]  (%p596_p5), %s638_s27, 128, %s636_s8, %s313_s9  }
 0x181 PF: > { %p409_p1 = scmp.ge.s32.totalorder %s520_s23, 2  ;;  %s339_s19 = sand.u32 1, %s508_s20  }
 0x182   : > { %s340_s24 = scalar_lea.sflag [#allocation4], %s339_s19 }
 0x183   : > { %p406_p2 = pnand %p409_p1, %p600_p6 }
 0x185   : > { %503 = dma.done.wait (!%p406_p2), %s340_s24, 128  }
 0x186   : > { %505 = vsyncadd (!%p406_p2), %s340_s24, 4294967168  ;;  %p16_p3 = scmp.ge.s32.totalorder %s583_s25, 4   ;;  %s686_s20 = smov %s512_s21 }
 0x187   : > { %s687_s21 = smov %s516_s22  ;;  %s688_s22 = smov %s594_s28 }
 0x188   : > { %s689_s23 = smov %s583_s25  ;;  %18 = sbr.rel (!%p16_p3) target bundleno = 5 (0x5), region = 75 }
 0x18f   :  { %345 = vsyncpa [#allocation4], 1 }
 0x190   :  { %347 = vsyncpa [#allocation4 + $0x1], 1 }

</bundles_post_ra>
